<compile_context>
chip_gen: v7x
topology: tpu7x:2x2x1
jax: 0.10.0
libtpu: 0.0.40
codegen_flags: <defaults>
</compile_context>

<pallas_src>
import functools

import jax
import jax.numpy as jnp
from jax.experimental import pallas as pl
from jax.experimental.pallas import tpu as pltpu

DIM = 128


def _round_up(x, m):
    return ((x + m - 1) // m) * m


def decoder_kernel(s_ref, w1_ref, b1_ref, w2_ref, b2_ref, w3_ref, b3_ref, out_ref):
    wdt = w1_ref.dtype  # matmul operand dtype (bf16 fast path, f32 for exactness checks)

    # fc1 + relu  (K = true s_dim; MXU underfill is irrelevant — kernel is mem-bound)
    h = jnp.dot(s_ref[...].astype(wdt), w1_ref[...], preferred_element_type=jnp.float32)
    h = jnp.maximum(h + b1_ref[...], 0.0)
    # fc2 + relu
    h = jnp.dot(h.astype(wdt), w2_ref[...], preferred_element_type=jnp.float32)
    h = jnp.maximum(h + b2_ref[...], 0.0)
    # fc3 + tanh  (N = true o_dim; masked vst on 16 lanes is cheaper than 8x HBM bytes)
    x = jnp.dot(h.astype(wdt), w3_ref[...], preferred_element_type=jnp.float32)
    out_ref[...] = jnp.tanh(x + b3_ref[...]).astype(out_ref.dtype)


def prepare_params(params, weight_dtype=jnp.bfloat16):
    """One-time weight prep (hoisted out of the per-call path).

    PyTorch convention in:  w* = [out, in], b* = [out].
    Kernel convention out:  w*t = [in, out] (weight_dtype), b* = [1, out] (f32).
    No padding: true widths are streamed directly.
    """
    w1t = params["w1"].T.astype(weight_dtype)             # [s_dim, DIM]
    w2t = params["w2"].T.astype(weight_dtype)             # [DIM,   DIM]
    w3t = params["w3"].T.astype(weight_dtype)             # [DIM, o_dim]
    b1 = params["b1"].reshape(1, -1).astype(jnp.float32)  # [1, DIM]
    b2 = params["b2"].reshape(1, -1).astype(jnp.float32)  # [1, DIM]
    b3 = params["b3"].reshape(1, -1).astype(jnp.float32)  # [1, o_dim]
    return {"w1t": w1t, "b1": b1, "w2t": w2t, "b2": b2, "w3t": w3t, "b3": b3}


@functools.partial(jax.jit, static_argnames=("tile_m",))
def decoder_forward(s, prep, tile_m=512):
    """s: [B, s_dim] float32; prep: output of prepare_params. Returns [B, o_dim] f32."""
    B, s_dim = s.shape
    o_dim = prep["w3t"].shape[1]  # static (shape attribute, not a tracer)

    # Batch tile: default 512 (mem-bound sweet spot); rows only need sublane=8 alignment.
    tm = min(tile_m, _round_up(B, 8))
    # v7x megacore: make sure there are >= 2 batch tiles when there is enough work to
    # split, otherwise one TensorCore idles and "parallel" is a no-op.
    if pl.cdiv(B, tm) < 2 and B >= 64:
        tm = _round_up(pl.cdiv(B, 2), 8)

    grid = (pl.cdiv(B, tm),)

    def const(arr):  # weights/biases: resident in VMEM across all batch tiles
        return pl.BlockSpec(arr.shape, lambda i: (0, 0))

    cost = pl.CostEstimate(
        flops=2 * B * (s_dim * DIM + DIM * DIM + DIM * o_dim),
        transcendentals=B * o_dim,
        bytes_accessed=(s.size * s.dtype.itemsize
                        + sum(int(prep[k].size) * prep[k].dtype.itemsize
                              for k in ("w1t", "b1", "w2t", "b2", "w3t", "b3"))
                        + B * o_dim * 4),
    )

    out = pl.pallas_call(
        decoder_kernel,
        out_shape=jax.ShapeDtypeStruct((B, o_dim), jnp.float32),
        grid=grid,
        in_specs=[
            pl.BlockSpec((tm, s_dim), lambda i: (i, 0)),   # streamed input at true width
            const(prep["w1t"]), const(prep["b1"]),
            const(prep["w2t"]), const(prep["b2"]),
            const(prep["w3t"]), const(prep["b3"]),
        ],
        out_specs=pl.BlockSpec((tm, o_dim), lambda i: (i, 0)),  # true-width output
        compiler_params=pltpu.CompilerParams(
            dimension_semantics=("parallel",),   # shard batch tiles across TCs (v7x)
        ),
        cost_estimate=cost,
    )(s, prep["w1t"], prep["b1"], prep["w2t"], prep["b2"], prep["w3t"], prep["b3"])

    return out


def init_params(key, s_dim, o_dim):
    """Deterministic init matching nn.Linear parameter shapes (weight [out,in], bias [out])."""
    ks = jax.random.split(key, 6)

    def lin_init(kw, kb, fan_in, fan_out):
        bound = 1.0 / jnp.sqrt(fan_in)
        w = jax.random.uniform(kw, (fan_out, fan_in), jnp.float32, -bound, bound)
        b = jax.random.uniform(kb, (fan_out,), jnp.float32, -bound, bound)
        return w, b

    w1, b1 = lin_init(ks[0], ks[1], s_dim, DIM)
    w2, b2 = lin_init(ks[2], ks[3], DIM, DIM)
    w3, b3 = lin_init(ks[4], ks[5], DIM, o_dim)
    return {"w1": w1, "b1": b1, "w2": w2, "b2": b2, "w3": w3, "b3": b3}


if __name__ == "__main__":
    key = jax.random.PRNGKey(0)
    k_in, k_par = jax.random.split(key)

    B, s_dim, o_dim = 8, 32, 16
    s = jax.random.normal(k_in, (B, s_dim), jnp.float32)
    params = init_params(k_par, s_dim, o_dim)

    # --- Exact-semantics check: f32 weights must match the PyTorch-convention reference.
    prep_f32 = prepare_params(params, weight_dtype=jnp.float32)
    out_f32 = jax.block_until_ready(decoder_forward(s, prep_f32))

    h = jnp.maximum(s @ params["w1"].T + params["b1"], 0.0)
    h = jnp.maximum(h @ params["w2"].T + params["b2"], 0.0)
    ref_f32 = jnp.tanh(h @ params["w3"].T + params["b3"])
    assert out_f32.shape == (B, o_dim)
    assert jnp.allclose(out_f32, ref_f32, atol=1e-5, rtol=1e-5)

    # --- Perf path: bf16 matmul operands, f32 accumulation (MXU fast path on all gens).
    prep_bf16 = prepare_params(params)  # default weight_dtype=bfloat16
    out_bf16 = jax.block_until_ready(decoder_forward(s, prep_bf16))

    cast = lambda x: x.astype(jnp.bfloat16).astype(jnp.float32)
    hb = jnp.maximum(cast(s) @ cast(params["w1"].T) + params["b1"], 0.0)
    hb = jnp.maximum(cast(hb) @ cast(params["w2"].T) + params["b2"], 0.0)
    ref_bf16 = jnp.tanh(cast(hb) @ cast(params["w3"].T) + params["b3"])
    assert out_bf16.shape == (B, o_dim)
    assert jnp.allclose(out_bf16, ref_bf16, atol=2e-3, rtol=2e-3)
    assert jnp.allclose(out_bf16, ref_f32, atol=5e-2, rtol=5e-2)

    print("KERNEL_OK")
</pallas_src>

<mosaic_0001>
module attributes {stable_mosaic.version = 11 : i64} {
  func.func @decoder_kernel(%arg0: i32, %arg1: memref<8x32xf32, #tpu.memory_space<vmem>>, %arg2: memref<32x128xf32, #tpu.memory_space<vmem>>, %arg3: memref<1x128xf32, #tpu.memory_space<vmem>>, %arg4: memref<128x128xf32, #tpu.memory_space<vmem>>, %arg5: memref<1x128xf32, #tpu.memory_space<vmem>>, %arg6: memref<128x16xf32, #tpu.memory_space<vmem>>, %arg7: memref<1x16xf32, #tpu.memory_space<vmem>>, %arg8: memref<8x16xf32, #tpu.memory_space<vmem>>) attributes {dimension_semantics = [#tpu.dimension_semantics<parallel>], iteration_bounds = array<i64: 1>, scalar_prefetch = 0 : i64, scratch_operands = 0 : i64, tpu.core_type = #tpu.core_type<tc>, window_params = [{transform_indices = @transform_0, window_bounds = array<i64: 8, 32>}, {pipeline_mode = #tpu.pipeline_mode<synchronous>, transform_indices = @transform_1, window_bounds = array<i64: 32, 128>}, {pipeline_mode = #tpu.pipeline_mode<synchronous>, transform_indices = @transform_2, window_bounds = array<i64: 1, 128>}, {pipeline_mode = #tpu.pipeline_mode<synchronous>, transform_indices = @transform_3, window_bounds = array<i64: 128, 128>}, {pipeline_mode = #tpu.pipeline_mode<synchronous>, transform_indices = @transform_4, window_bounds = array<i64: 1, 128>}, {pipeline_mode = #tpu.pipeline_mode<synchronous>, transform_indices = @transform_5, window_bounds = array<i64: 128, 16>}, {pipeline_mode = #tpu.pipeline_mode<synchronous>, transform_indices = @transform_6, window_bounds = array<i64: 1, 16>}, {transform_indices = @transform_7, window_bounds = array<i64: 8, 16>}]} {
    %c0 = arith.constant 0 : index
    %c0_0 = arith.constant 0 : index
    %0 = vector.load %arg1[%c0, %c0_0] : memref<8x32xf32, #tpu.memory_space<vmem>>, vector<8x32xf32>
    %c0_1 = arith.constant 0 : index
    %c0_2 = arith.constant 0 : index
    %1 = vector.load %arg2[%c0_1, %c0_2] : memref<32x128xf32, #tpu.memory_space<vmem>>, vector<32x128xf32>
    %cst = arith.constant dense<0.000000e+00> : vector<8x128xf32>
    %2 = tpu.matmul %0, %1, %cst {dimension_numbers = #tpu.dot_dimension_numbers<[1], [0], [0], [1], [0, 0, 1, 1], [], []>} : vector<8x32xf32>, vector<32x128xf32>, vector<8x128xf32> -> vector<8x128xf32>
    %c0_3 = arith.constant 0 : index
    %c0_4 = arith.constant 0 : index
    %3 = vector.load %arg3[%c0_3, %c0_4] : memref<1x128xf32, #tpu.memory_space<vmem>>, vector<1x128xf32>
    %4 = vector.broadcast %3 : vector<1x128xf32> to vector<8x128xf32>
    %5 = arith.addf %2, %4 : vector<8x128xf32>
    %cst_5 = arith.constant 0.000000e+00 : f32
    %6 = vector.broadcast %cst_5 : f32 to vector<8x128xf32>
    %7 = arith.maximumf %5, %6 : vector<8x128xf32>
    %c0_6 = arith.constant 0 : index
    %c0_7 = arith.constant 0 : index
    %8 = vector.load %arg4[%c0_6, %c0_7] : memref<128x128xf32, #tpu.memory_space<vmem>>, vector<128x128xf32>
    %cst_8 = arith.constant dense<0.000000e+00> : vector<8x128xf32>
    %9 = tpu.matmul %7, %8, %cst_8 {dimension_numbers = #tpu.dot_dimension_numbers<[1], [0], [0], [1], [0, 0, 1, 1], [], []>} : vector<8x128xf32>, vector<128x128xf32>, vector<8x128xf32> -> vector<8x128xf32>
    %c0_9 = arith.constant 0 : index
    %c0_10 = arith.constant 0 : index
    %10 = vector.load %arg5[%c0_9, %c0_10] : memref<1x128xf32, #tpu.memory_space<vmem>>, vector<1x128xf32>
    %11 = vector.broadcast %10 : vector<1x128xf32> to vector<8x128xf32>
    %12 = arith.addf %9, %11 : vector<8x128xf32>
    %cst_11 = arith.constant 0.000000e+00 : f32
    %13 = vector.broadcast %cst_11 : f32 to vector<8x128xf32>
    %14 = arith.maximumf %12, %13 : vector<8x128xf32>
    %c0_12 = arith.constant 0 : index
    %c0_13 = arith.constant 0 : index
    %15 = vector.load %arg6[%c0_12, %c0_13] : memref<128x16xf32, #tpu.memory_space<vmem>>, vector<128x16xf32>
    %cst_14 = arith.constant dense<0.000000e+00> : vector<8x16xf32>
    %16 = tpu.matmul %14, %15, %cst_14 {dimension_numbers = #tpu.dot_dimension_numbers<[1], [0], [0], [1], [0, 0, 1, 1], [], []>} : vector<8x128xf32>, vector<128x16xf32>, vector<8x16xf32> -> vector<8x16xf32>
    %c0_15 = arith.constant 0 : index
    %c0_16 = arith.constant 0 : index
    %17 = vector.load %arg7[%c0_15, %c0_16] : memref<1x16xf32, #tpu.memory_space<vmem>>, vector<1x16xf32>
    %18 = vector.broadcast %17 : vector<1x16xf32> to vector<8x16xf32>
    %19 = arith.addf %16, %18 : vector<8x16xf32>
    %20 = math.tanh %19 : vector<8x16xf32>
    %c0_17 = arith.constant 0 : index
    %c0_18 = arith.constant 0 : index
    %21 = vector.load %arg8[%c0_17, %c0_18] : memref<8x16xf32, #tpu.memory_space<vmem>>, vector<8x16xf32>
    tpu.vector_store %arg8[%c0_17, %c0_18], %20 {strides = array<i32>} : memref<8x16xf32, #tpu.memory_space<vmem>>, vector<8x16xf32>,
    return
  }
  func.func @transform_0(%arg0: i32) -> (i32, i32) {
    %c0_i32 = arith.constant 0 : i32
    %c0_i32_0 = arith.constant 0 : i32
    return %arg0, %c0_i32 : i32, i32
  }
  func.func @transform_1(%arg0: i32) -> (i32, i32) {
    %c0_i32 = arith.constant 0 : i32
    %c0_i32_0 = arith.constant 0 : i32
    %c0_i32_1 = arith.constant 0 : i32
    return %c0_i32, %c0_i32_0 : i32, i32
  }
  func.func @transform_2(%arg0: i32) -> (i32, i32) {
    %c0_i32 = arith.constant 0 : i32
    %c0_i32_0 = arith.constant 0 : i32
    %c0_i32_1 = arith.constant 0 : i32
    return %c0_i32, %c0_i32_0 : i32, i32
  }
  func.func @transform_3(%arg0: i32) -> (i32, i32) {
    %c0_i32 = arith.constant 0 : i32
    %c0_i32_0 = arith.constant 0 : i32
    %c0_i32_1 = arith.constant 0 : i32
    return %c0_i32, %c0_i32_0 : i32, i32
  }
  func.func @transform_4(%arg0: i32) -> (i32, i32) {
    %c0_i32 = arith.constant 0 : i32
    %c0_i32_0 = arith.constant 0 : i32
    %c0_i32_1 = arith.constant 0 : i32
    return %c0_i32, %c0_i32_0 : i32, i32
  }
  func.func @transform_5(%arg0: i32) -> (i32, i32) {
    %c0_i32 = arith.constant 0 : i32
    %c0_i32_0 = arith.constant 0 : i32
    %c0_i32_1 = arith.constant 0 : i32
    return %c0_i32, %c0_i32_0 : i32, i32
  }
  func.func @transform_6(%arg0: i32) -> (i32, i32) {
    %c0_i32 = arith.constant 0 : i32
    %c0_i32_0 = arith.constant 0 : i32
    %c0_i32_1 = arith.constant 0 : i32
    return %c0_i32, %c0_i32_0 : i32, i32
  }
  func.func @transform_7(%arg0: i32) -> (i32, i32) {
    %c0_i32 = arith.constant 0 : i32
    %c0_i32_0 = arith.constant 0 : i32
    return %arg0, %c0_i32 : i32, i32
  }
}

</mosaic_0001>

<bundles_post_ra>
// kernel: decoder_forward.1
= control target key start
LH: loop header
LB: loop body
LE: loop exit
PB: predicated region body
PF: predicated region fallthrough
CT: control target
= control target key end

     0   :  { %12 = vsyncpa [#allocation3], 0  ;;  %s819_s0 = inlined_call_operand.hbm [shape: f32[8,32], index: 0, kind: input, shape index: {}]   ;;  %s820_s1 = inlined_call_operand.vmem [shape: f32[32,128], index: 1, kind: input, shape index: {}]   ;;  %s821_s2 = inlined_call_operand.vmem [shape: f32[1,128], index: 2, kind: input, shape index: {}]   ;;  %s822_s3 = inlined_call_operand.vmem [shape: f32[128,128], index: 3, kind: input, shape index: {}]   ;;  %s823_s4 = inlined_call_operand.vmem [shape: f32[1,128], index: 4, kind: input, shape index: {}]   ;;  %s824_s5 = inlined_call_operand.vmem [shape: f32[128,16], index: 5, kind: input, shape index: {}]   ;;  %s825_s6 = inlined_call_operand.hbm [shape: f32[1,16], index: 6, kind: input, shape index: {}]   ;;  %s826_s7 = inlined_call_operand.hbm [shape: f32[8,16], index: 7, kind: output, shape index: {}]  }
   0x1   :  { %13 = vsyncpa [#allocation6], 0 }
   0x2   :  { %14 = vsyncpa [#allocation4], 0  ;;  %s602_s24 = smov [#allocation2]   ;;  %s603_s26 = smov [#allocation5]  }
   0x3   :  { %s21_s25 = sshll.u32 %s602_s24, 4  ;;  %s41_s27 = sshll.u32 %s603_s26, 4  ;;  %s22_s25 = int_to_ptr.vmem [resolvable:$true] %s21_s25  ;;  %s42_s27 = int_to_ptr.vmem [resolvable:$true] %s41_s27 }
   0x4   :  { %s530_s30 = scalar_lea.hbm %s819_s0, 128 }
   0x5   :  { %p531_p0 = scmp.ne.s32.totalorder %s819_s0, %s530_s30  ;;  %p534_p1 = scmp.lt.u32.totalorder %s530_s30, %s819_s0 }
   0x7   :  { %p536_p2 = pnand %p534_p1, %p531_p0 }
   0x9   :  { %539 = shalt.err (!%p536_p2)
}
   0xa   :  { %s540_s12 = scalar_lea.vmem %s22_s25, 128  ;;  %p545_p4 = scmp.lt.s32.totalorder %s22_s25, %s22_s25 }
   0xb   :  { %p541_p3 = scmp.ne.s32.totalorder %s22_s25, %s540_s12  ;;  %p546_p5 = scmp.lt.s32.totalorder %s540_s12, %s540_s12 }
   0xd   :  { %p547_p6 = por %p546_p5, %p545_p4 }
   0xf   :  { %p548_p7 = pnand %p547_p6, %p541_p3 }
  0x11   :  { %551 = shalt.err (!%p548_p7)
}
  0x12   :  { %24 = dma.hbm_to_vmem [thread:$0]  %s819_s0, 128, %s22_s25, [#allocation3]  }
  0x13   :  { %s552_s17 = scalar_lea.hbm %s825_s6, 16 }
  0x14   :  { %p553_p8 = scmp.ne.s32.totalorder %s825_s6, %s552_s17  ;;  %p556_p9 = scmp.lt.u32.totalorder %s552_s17, %s825_s6 }
  0x16   :  { %p558_p10 = pnand %p556_p9, %p553_p8 }
  0x18   :  { %561 = shalt.err (!%p558_p10)
}
  0x19   :  { %s562_s22 = scalar_lea.vmem %s42_s27, 16  ;;  %s566_s23 = scalar_lea.vmem %s42_s27, 32 }
  0x1a   :  { %p563_p11 = scmp.ne.s32.totalorder %s42_s27, %s562_s22  ;;  %p567_p12 = scmp.lt.s32.totalorder %s42_s27, %s42_s27 }
  0x1b   :  { %p568_p13 = scmp.lt.s32.totalorder %s566_s23, %s562_s22 }
  0x1d   :  { %p569_p0 = por %p568_p13, %p567_p12 }
  0x1f   :  { %p570_p1 = pnand %p569_p0, %p563_p11 }
  0x21   :  { %573 = shalt.err (!%p570_p1)
}
  0x22   :  { %44 = dma.hbm_to_vmem [thread:$0]  %s825_s6, 16, %s42_s27, [#allocation6]  }
  0x23   :  { %596 = dma.done.wait [#allocation3], 128  }
  0x24   :  { %597 = vsyncadd [#allocation3], 4294967168 }
  0x25   :  { %598 = dma.done.wait [#allocation6], 16  }
  0x26   :  { %599 = vsyncadd [#allocation6], 4294967280  ;;  %v604_v0 = vmov 0.0|0.0   ;;  %vm605_vm0 = vmmov 0   ;;  %v606_v1 = vmov 0.0   ;;  %v52_v2 = vld [vmem:[%s820_s1] sm:$0xff] }
  0x27   :  { %468 = vmatprep.subr.bf16.mxu0 %v604_v0  ;;  %395 = vmatprep.mubr.msk.f32.mxu0 %vm605_vm0, %v606_v1  ;;  %v53_v3 = vld [vmem:[%s820_s1 + $0x8] sm:$0xff]  ;;  %v54_v4 = vld [vmem:[%s820_s1 + $0x10] sm:$0xff]  ;;  %v55_v6 = vld [vmem:[%s820_s1 + $0x18] sm:$0xff]  ;;  %vm63_vm1 = vcmask 261120   ;;  %vm326_vm2 = vcmask 130048  }
  0x28   :  { %474 = vmatprep.subr.bf16.mxu1 %v604_v0  ;;  %430 = vmatprep.mubr.msk.f32.mxu1 %vm605_vm0, %v606_v1  ;;  %v469_v5 = vpack.c.bf16 %v53_v3, %v52_v2  ;;  %v138_v7 = vld [vmem:[%s822_s3] sm:$0xff]  ;;  %v139_v8 = vld [vmem:[%s822_s3 + $0x8] sm:$0xff]  ;;  %v140_v9 = vld [vmem:[%s822_s3 + $0x10] sm:$0xff]  ;;  %v472_v11 = vpack.c.bf16 %v55_v6, %v54_v4 }
  0x29   :  { %v141_v10 = vld [vmem:[%s822_s3 + $0x18] sm:$0xff]  ;;  %v475_v12 = vpack.c.bf16 %v139_v8, %v138_v7  ;;  %v142_v14 = vld [vmem:[%s822_s3 + $0x20] sm:$0xff]  ;;  %v143_v15 = vld [vmem:[%s822_s3 + $0x28] sm:$0xff] }
  0x2a   :  { %470 = vmatpush3.bf16.msra.mxu0 %v469_v5  ;;  %v478_v13 = vpack.c.bf16 %v141_v10, %v140_v9  ;;  %v51_v16 = vld [vmem:[#allocation2] sm:$0xff]  ;;  %v481_v17 = vpack.c.bf16 %v143_v15, %v142_v14  ;;  %v144_v18 = vld [vmem:[%s822_s3 + $0x30] sm:$0xff]  ;;  %v145_v19 = vld [vmem:[%s822_s3 + $0x38] sm:$0xff] }
  0x2b   :  { %471 = vmatprep.subr.bf16.mxu0 %v604_v0  ;;  %476 = vmatpush3.bf16.msra.mxu1 %v475_v12  ;;  %v484_v20 = vpack.c.bf16 %v145_v19, %v144_v18  ;;  %v146_v21 = vld [vmem:[%s822_s3 + $0x40] sm:$0xff]  ;;  %v147_v22 = vld [vmem:[%s822_s3 + $0x48] sm:$0xff]  ;;  %v148_v24 = vld [vmem:[%s822_s3 + $0x50] sm:$0xff] }
  0x2c   :  { %477 = vmatprep.subr.bf16.mxu1 %v604_v0  ;;  %v487_v23 = vpack.c.bf16 %v147_v22, %v146_v21  ;;  %v149_v25 = vld [vmem:[%s822_s3 + $0x58] sm:$0xff]  ;;  %v150_v27 = vld [vmem:[%s822_s3 + $0x60] sm:$0xff]  ;;  %v151_v28 = vld [vmem:[%s822_s3 + $0x68] sm:$0xff] }
  0x2d   :  { %v490_v26 = vpack.c.bf16 %v149_v25, %v148_v24  ;;  %v493_v29 = vpack.c.bf16 %v151_v28, %v150_v27  ;;  %v152_v30 = vld [vmem:[%s822_s3 + $0x70] sm:$0xff]  ;;  %v153_v31 = vld [vmem:[%s822_s3 + $0x78] sm:$0xff]  ;;  %v232_v33 = vld [vmem:[%s824_s5] sm:$0xff] }
  0x2e   :  { %473 = vmatpush3.bf16.msra.mxu0 %v472_v11  ;;  %v496_v32 = vpack.c.bf16 %v153_v31, %v152_v30  ;;  %v233_v34 = vld [vmem:[%s824_s5 + $0x8] sm:$0xff]  ;;  %v234_v35 = vld [vmem:[%s824_s5 + $0x10] sm:$0xff]  ;;  %v235_v37 = vld [vmem:[%s824_s5 + $0x18] sm:$0xff] }
  0x2f   :  { %498 = vmatprep.subr.bf16.mxu0 %v604_v0  ;;  %479 = vmatpush3.bf16.msra.mxu1 %v478_v13  ;;  %v499_v36 = vpack.c.bf16 %v233_v34, %v232_v33  ;;  %v502_v38 = vpack.c.bf16 %v235_v37, %v234_v35  ;;  %v236_v39 = vld [vmem:[%s824_s5 + $0x20] sm:$0xff]  ;;  %v237_v40 = vld [vmem:[%s824_s5 + $0x28] sm:$0xff]  ;;  %v238_v42 = vld [vmem:[%s824_s5 + $0x30] sm:$0xff] }
  0x30   :  { %480 = vmatprep.subr.bf16.mxu1 %v604_v0  ;;  %v505_v41 = vpack.c.bf16 %v237_v40, %v236_v39  ;;  %v239_v43 = vld [vmem:[%s824_s5 + $0x38] sm:$0xff]  ;;  %v240_v45 = vld [vmem:[%s824_s5 + $0x40] sm:$0xff]  ;;  %v241_v46 = vld [vmem:[%s824_s5 + $0x48] sm:$0xff] }
  0x31   :  { %396 = vmatmul.mubr.msk.f32.vlgmr.msra.gmra.mrb[0].mxu0 %vm63_vm1, %v51_v16  ;;  %v508_v44 = vpack.c.bf16 %v239_v43, %v238_v42  ;;  %v511_v47 = vpack.c.bf16 %v241_v46, %v240_v45  ;;  %v242_v48 = vld [vmem:[%s824_s5 + $0x50] sm:$0xff]  ;;  %v243_v49 = vld [vmem:[%s824_s5 + $0x58] sm:$0xff]  ;;  %v244_v51 = vld [vmem:[%s824_s5 + $0x60] sm:$0xff] }
  0x32   :  { %465 = vmatprep.mubr.msk.f32.mxu0 %vm605_vm0, %v606_v1  ;;  %500 = vmatpush3.bf16.msra.mxu0 %v499_v36  ;;  %v514_v50 = vpack.c.bf16 %v243_v49, %v242_v48  ;;  %v245_v52 = vld [vmem:[%s824_s5 + $0x68] sm:$0xff]  ;;  %v344_v54 = vld [vmem:[%s821_s2] ss:$0 sm:$0xff]  ;;  %v246_v59 = vld [vmem:[%s824_s5 + $0x70] sm:$0xff]  ;;  %s607_s2 = smov [#allocation7]  }
  0x33   :  { %482 = vmatpush3.bf16.msra.mxu1 %v481_v17  ;;  %501 = vmatprep.subr.bf16.mxu0 %v604_v0  ;;  %v517_v53 = vpack.c.bf16 %v245_v52, %v244_v51  ;;  %v247_v60 = vld [vmem:[%s824_s5 + $0x78] sm:$0xff]  ;;  %v346_v62 = vld [vmem:[%s823_s4] ss:$0 sm:$0xff]  ;;  %v347_v3 = vld [vmem:[#allocation5] ss:$0 sm:$0xff]  ;;  %s334_s22 = sshll.u32 %s607_s2, 4  ;;  %s335_s22 = int_to_ptr.vmem [resolvable:$true] %s334_s22 }
  0x34   :  { %483 = vmatprep.subr.bf16.mxu1 %v604_v0  ;;  %v520_v61 = vpack.c.bf16 %v247_v60, %v246_v59  ;;  %s574_s5 = scalar_lea.vmem %s335_s22, 128  ;;  %p579_p3 = scmp.lt.s32.totalorder %s335_s22, %s335_s22 }
  0x35   :  { %p575_p2 = scmp.ne.s32.totalorder %s335_s22, %s574_s5  ;;  %p580_p4 = scmp.lt.s32.totalorder %s574_s5, %s574_s5 }
  0x36   :  { %503 = vmatpush3.bf16.msra.mxu0 %v502_v38 }
  0x37   :  { %485 = vmatpush3.bf16.msra.mxu1 %v484_v20  ;;  %504 = vmatprep.subr.bf16.mxu0 %v604_v0  ;;  %p581_p5 = por %p580_p4, %p579_p3 }
  0x38   :  { %486 = vmatprep.subr.bf16.mxu1 %v604_v0 }
  0x39   :  { %p582_p6 = pnand %p581_p5, %p575_p2 }
  0x3a   :  { %506 = vmatpush3.bf16.msra.mxu0 %v505_v41 }
  0x3b   :  { %488 = vmatpush3.bf16.msra.mxu1 %v487_v23  ;;  %507 = vmatprep.subr.bf16.mxu0 %v604_v0 }
  0x3c   :  { %489 = vmatprep.subr.bf16.mxu1 %v604_v0 }
  0x3e   :  { %509 = vmatpush3.bf16.msra.mxu0 %v508_v44 }
  0x3f   :  { %491 = vmatpush3.bf16.msra.mxu1 %v490_v26  ;;  %510 = vmatprep.subr.bf16.mxu0 %v604_v0 }
  0x40   :  { %492 = vmatprep.subr.bf16.mxu1 %v604_v0 }
  0x42   :  { %512 = vmatpush3.bf16.msra.mxu0 %v511_v47 }
  0x43   :  { %494 = vmatpush3.bf16.msra.mxu1 %v493_v29  ;;  %513 = vmatprep.subr.bf16.mxu0 %v604_v0 }
  0x44   :  { %495 = vmatprep.subr.bf16.mxu1 %v604_v0 }
  0x46   :  { %515 = vmatpush3.bf16.msra.mxu0 %v514_v50 }
  0x47   :  { %497 = vmatpush3.bf16.msra.mxu1 %v496_v32  ;;  %516 = vmatprep.subr.bf16.mxu0 %v604_v0 }
  0x4a   :  { %518 = vmatpush3.bf16.msra.mxu0 %v517_v53 }
  0x4b   :  { %519 = vmatprep.subr.bf16.mxu0 %v604_v0 }
  0x4e   :  { %521 = vmatpush3.bf16.msra.mxu0 %v520_v61 }
 0x104   :  { %v133_v55 = vpop.f32.mrb[0].mxu0 }
 0x105   :  { %v134_v56 = vadd.f32 %v344_v54, %v133_v55  ;;  %v397_v57 = vpop.f32.mrb[1].mxu0 }
 0x107   :  { %v137_v58 = vmax.f32 %v134_v56, 0.0 }
 0x109   :  { %431 = vmatmul.mubr.f32.vlgmr.msra.gmra.mrb[0].mxu1 %v137_v58 }
 0x1dc   :  { %v227_v63 = vpop.f32.mrb[0].mxu1 }
 0x1dd   :  { %v228_v0 = vadd.f32 %v346_v62, %v227_v63  ;;  %v432_v1 = vpop.f32.mrb[1].mxu1 }
 0x1df   :  { %v231_v2 = vmax.f32 %v228_v0, 0.0 }
 0x1e1   :  { %466 = vmatmul.mubr.f32.vlgmr.msra.gmra.mrb[2].mxu0 %v231_v2 }
 0x2b4   :  { %v321_v4 = vpop.f32.mrb[2].mxu0 }
 0x2b5   :  { %v322_v5 = vadd.f32 %v347_v3, %v321_v4  ;;  %v467_v6 = vpop.f32.mrb[3].mxu0 }
 0x2b7   :  { %528 = vtanh.f32 %v322_v5 }
 0x2c1   :  { %v529_v7 = vpop.eup %528 }
 0x2c2   :  { %327 = vst.msk [vmem:[#allocation7] sm:$0xff] %vm326_vm2, %v529_v7 }
 0x2c3   :  { %585 = shalt.err (!%p582_p6)
}
 0x2c4   :  { %s586_s0 = scalar_lea.hbm %s826_s7, 128 }
 0x2c5   :  { %p587_p7 = scmp.ne.s32.totalorder %s826_s7, %s586_s0  ;;  %p590_p8 = scmp.lt.u32.totalorder %s586_s0, %s826_s7 }
 0x2c7   :  { %p592_p9 = pnand %p590_p8, %p587_p7 }
 0x2c9   :  { %595 = shalt.err (!%p592_p9)
}
 0x2ca   :  { %337 = dma.vmem_to_hbm [thread:$0]  %s335_s22, 128, %s826_s7, [#allocation4]  }
 0x2cb   :  { %600 = dma.done.wait [#allocation4], 128  }
 0x2cc   :  { %601 = vsyncadd [#allocation4], 4294967168 }
 0x2cd   :  { %341 = vsyncpa [#allocation3], 1 }
 0x2ce   :  { %342 = vsyncpa [#allocation6], 1 }
 0x2cf   :  { %343 = vsyncpa [#allocation4], 1 }

</bundles_post_ra>
